<compile_context>
chip_gen: v5e
topology: v5e:2x2
jax: 0.10.0
libtpu: 0.0.40
codegen_flags: <defaults>
</compile_context>

<pallas_src>
import functools

import jax
import jax.numpy as jnp
from jax.experimental import pallas as pl
from jax.experimental.pallas import tpu as pltpu

NEG_SLOPE = 0.01  # F.leaky_relu default negative_slope

# Lane-aligned (padded) layer widths.
H12 = 128    # fc1 / fc2 out: 100 -> 128 (per branch; fused width = 256)
H3 = 512     # fc3 out:       500 -> 512
H4 = 256     # fc4 out:       250 -> 256
H5 = 128     # fc5 out:       125 -> 128
HOUT = 128   # fc6 out:       out_feature -> 128 (lane-dense output store)

TB_MAX = 1024  # max batch tile (sweep candidate per review: 512/1024/2048)


def _leaky_relu(x):
    return jnp.where(x > 0, x, NEG_SLOPE * x)


def _round_up(x, m):
    return ((x + m - 1) // m) * m


def net_kernel(x_ref,
               w12_ref, b12_ref,
               w3_ref, b3_ref,
               w4_ref, b4_ref,
               w5_ref, b5_ref,
               w6_ref, b6_ref,
               out_ref):
    f32 = jnp.float32
    bf16 = jnp.bfloat16

    # Fused fc1 + fc2 (block-diagonal weight) -> bias -> leaky_relu.
    # Lanes 0..127 hold the data branch, lanes 128..255 the foil branch,
    # which matches the row layout of the padded fc3 weight.
    h = jnp.dot(x_ref[...].astype(bf16), w12_ref[...],
                preferred_element_type=f32)
    h = _leaky_relu(h + b12_ref[...])

    # fc3 -> leaky_relu (single K=256 MXU pass; no concat scratch needed).
    x = jnp.dot(h.astype(bf16), w3_ref[...], preferred_element_type=f32)
    x = _leaky_relu(x + b3_ref[...])

    # fc4 -> leaky_relu
    x = jnp.dot(x.astype(bf16), w4_ref[...], preferred_element_type=f32)
    x = _leaky_relu(x + b4_ref[...])

    # fc5 -> leaky_relu
    x = jnp.dot(x.astype(bf16), w5_ref[...], preferred_element_type=f32)
    x = _leaky_relu(x + b5_ref[...])

    # fc6 (no activation); lane-dense padded bf16 store.
    x = jnp.dot(x.astype(bf16), w6_ref[...], preferred_element_type=f32)
    out_ref[...] = (x + b6_ref[...]).astype(out_ref.dtype)


def prepare_params(params):
    """One-time host-side prep: fuse fc1/fc2, zero-pad to lane-aligned widths,
    cast weights to bf16 (biases stay f32 for the f32 epilogues).

    Padding is benign: padded bias lanes are 0, leaky_relu(0) == 0, and the
    corresponding rows of the next padded weight matrix are 0, so padded
    lanes never leak into real outputs.  The wrapper slices the output back
    to out_feature.
    """
    (w1, b1, w2, b2, w3, b3, w4, b4, w5, b5, w6, b6) = params
    in_feature = w1.shape[0]
    foil_feature = w2.shape[0]
    n1 = w1.shape[1]   # 100
    n2 = w2.shape[1]   # 100

    def pad_w(w, rows, cols):
        out = jnp.zeros((rows, cols), jnp.float32)
        return out.at[:w.shape[0], :w.shape[1]].set(w)

    def pad_b(b, cols):
        out = jnp.zeros((1, cols), jnp.float32)
        return out.at[:, :b.shape[-1]].set(b.reshape(1, -1))

    # Fused block-diagonal fc1/fc2 weight: (in + foil, 256).
    w12 = jnp.zeros((in_feature + foil_feature, 2 * H12), jnp.float32)
    w12 = w12.at[:in_feature, :n1].set(w1)
    w12 = w12.at[in_feature:, H12:H12 + n2].set(w2)
    b12 = jnp.zeros((1, 2 * H12), jnp.float32)
    b12 = b12.at[0, :n1].set(b1)
    b12 = b12.at[0, H12:H12 + n2].set(b2)

    # fc3 weight: rows 0..n1-1 multiply the data branch (lanes 0..127),
    # rows n1..n1+n2-1 multiply the foil branch -> placed at rows 128..227.
    w3p = jnp.zeros((2 * H12, H3), jnp.float32)
    w3p = w3p.at[:n1, :w3.shape[1]].set(w3[:n1])
    w3p = w3p.at[H12:H12 + n2, :w3.shape[1]].set(w3[n1:])

    w4p = pad_w(w4, H3, H4)
    w5p = pad_w(w5, H4, H5)
    w6p = pad_w(w6, H5, HOUT)

    bf16 = jnp.bfloat16
    return (w12.astype(bf16), b12,
            w3p.astype(bf16), pad_b(b3, H3),
            w4p.astype(bf16), pad_b(b4, H4),
            w5p.astype(bf16), pad_b(b5, H5),
            w6p.astype(bf16), pad_b(b6, HOUT))


@functools.partial(jax.jit, static_argnames=("out_feature",))
def net_forward(data, foil, prepped, *, out_feature):
    batch = data.shape[0]

    # Single fused input: concat(data, foil) along features (cheap XLA concat
    # in the wrapper, one DMA stream into the kernel).
    x = jnp.concatenate([data, foil], axis=1)
    in_total = x.shape[1]

    # Batch tile: large tiles amortize per-grid-step overhead; padded rows are
    # zero and sliced off at the end.
    tb = min(TB_MAX, _round_up(batch, 8))
    b_pad = _round_up(batch, tb)
    # v7x: ensure >= 2 grid steps for big batches so both TensorCores get
    # work under dimension_semantics=("parallel",).  No effect on v5e/v6e.
    if b_pad // tb == 1 and tb > 512:
        tb = _round_up(tb // 2, 8)
        b_pad = _round_up(batch, tb)
    if b_pad != batch:
        x = jnp.pad(x, ((0, b_pad - batch), (0, 0)))
    grid = (b_pad // tb,)

    x_spec = pl.BlockSpec((tb, in_total), lambda i: (i, 0))
    # Weights/biases: constant index_map -> fetched once, VMEM-resident across
    # all grid steps while the activation tiles pipeline.
    w_specs = [pl.BlockSpec(p.shape, lambda i: (0, 0)) for p in prepped]
    out_spec = pl.BlockSpec((tb, HOUT), lambda i: (i, 0))

    flops = 2 * b_pad * (in_total * 2 * H12 + 2 * H12 * H3
                         + H3 * H4 + H4 * H5 + H5 * HOUT)
    weight_bytes = sum(int(p.size) * p.dtype.itemsize for p in prepped)
    act_bytes = b_pad * (in_total * 4 + HOUT * 2)
    cost = pl.CostEstimate(flops=flops, transcendentals=0,
                           bytes_accessed=weight_bytes + act_bytes)

    out_padded = pl.pallas_call(
        net_kernel,
        out_shape=jax.ShapeDtypeStruct((b_pad, HOUT), jnp.bfloat16),
        grid_spec=pltpu.PrefetchScalarGridSpec(
            num_scalar_prefetch=0,
            grid=grid,
            in_specs=[x_spec] + w_specs,
            out_specs=out_spec,
        ),
        compiler_params=pltpu.CompilerParams(
            dimension_semantics=("parallel",),
            # Explicit scoped-VMEM budget so TB up to 1024 is safe on v5e's
            # 16 MiB default; 48 MiB is still well under v7x's 64 MiB phys.
            vmem_limit_bytes=48 * 1024 * 1024,
        ),
        cost_estimate=cost,
    )(x, *prepped)

    return out_padded[:batch, :out_feature].astype(jnp.float32)


def init_params(key, in_feature, out_feature):
    """Deterministic parameter init (uniform +/- 1/sqrt(fan_in), like torch)."""
    sizes = [(in_feature, 100), (3, 100), (200, 500),
             (500, 250), (250, 125), (125, out_feature)]
    params = []
    for (fan_in, fan_out) in sizes:
        key, kw, kb = jax.random.split(key, 3)
        bound = 1.0 / jnp.sqrt(jnp.float32(fan_in))
        w = jax.random.uniform(kw, (fan_in, fan_out), jnp.float32,
                               minval=-bound, maxval=bound)
        b = jax.random.uniform(kb, (fan_out,), jnp.float32,
                               minval=-bound, maxval=bound)
        params += [w, b]
    return tuple(params)


def net_reference(data, foil, params):
    """Plain-JAX f32 reference of the PyTorch forward."""
    (w1, b1, w2, b2, w3, b3, w4, b4, w5, b5, w6, b6) = params
    lrelu = lambda v: jnp.where(v > 0, v, NEG_SLOPE * v)
    d = lrelu(data @ w1 + b1)
    f = lrelu(foil @ w2 + b2)
    x = jnp.concatenate([d, f], axis=1)
    x = lrelu(x @ w3 + b3)
    x = lrelu(x @ w4 + b4)
    x = lrelu(x @ w5 + b5)
    return x @ w6 + b6


if __name__ == "__main__":
    key = jax.random.PRNGKey(0)
    in_feature, out_feature = 16, 4
    batch = 8

    kp, kd, kf = jax.random.split(key, 3)
    params = init_params(kp, in_feature, out_feature)
    data = jax.random.normal(kd, (batch, in_feature), jnp.float32)
    foil = jax.random.normal(kf, (batch, 3), jnp.float32)

    prepped = prepare_params(params)  # one-time fused / padded / bf16 prep
    out = net_forward(data, foil, prepped, out_feature=out_feature)
    out = jax.block_until_ready(out)

    ref = net_reference(data, foil, params)
    assert out.shape == (batch, out_feature)
    # bf16 weights + bf16 output store (f32 accumulation) => compare against
    # the f32 reference with bf16-level tolerance.
    assert jnp.allclose(out, ref, atol=5e-2, rtol=5e-2), "mismatch vs reference"

    print("KERNEL_OK")
</pallas_src>

<mosaic_0001>
module attributes {stable_mosaic.version = 11 : i64} {
  func.func @net_kernel(%arg0: i32, %arg1: memref<8x19xf32, #tpu.memory_space<vmem>>, %arg2: memref<19x256xbf16, #tpu.memory_space<vmem>>, %arg3: memref<1x256xf32, #tpu.memory_space<vmem>>, %arg4: memref<256x512xbf16, #tpu.memory_space<vmem>>, %arg5: memref<1x512xf32, #tpu.memory_space<vmem>>, %arg6: memref<512x256xbf16, #tpu.memory_space<vmem>>, %arg7: memref<1x256xf32, #tpu.memory_space<vmem>>, %arg8: memref<256x128xbf16, #tpu.memory_space<vmem>>, %arg9: memref<1x128xf32, #tpu.memory_space<vmem>>, %arg10: memref<128x128xbf16, #tpu.memory_space<vmem>>, %arg11: memref<1x128xf32, #tpu.memory_space<vmem>>, %arg12: memref<8x128xbf16, #tpu.memory_space<vmem>>) attributes {dimension_semantics = [#tpu.dimension_semantics<parallel>], iteration_bounds = array<i64: 1>, scalar_prefetch = 0 : i64, scratch_operands = 0 : i64, tpu.core_type = #tpu.core_type<tc>, window_params = [{transform_indices = @transform_0, window_bounds = array<i64: 8, 19>}, {pipeline_mode = #tpu.pipeline_mode<synchronous>, transform_indices = @transform_1, window_bounds = array<i64: 19, 256>}, {pipeline_mode = #tpu.pipeline_mode<synchronous>, transform_indices = @transform_2, window_bounds = array<i64: 1, 256>}, {pipeline_mode = #tpu.pipeline_mode<synchronous>, transform_indices = @transform_3, window_bounds = array<i64: 256, 512>}, {pipeline_mode = #tpu.pipeline_mode<synchronous>, transform_indices = @transform_4, window_bounds = array<i64: 1, 512>}, {pipeline_mode = #tpu.pipeline_mode<synchronous>, transform_indices = @transform_5, window_bounds = array<i64: 512, 256>}, {pipeline_mode = #tpu.pipeline_mode<synchronous>, transform_indices = @transform_6, window_bounds = array<i64: 1, 256>}, {pipeline_mode = #tpu.pipeline_mode<synchronous>, transform_indices = @transform_7, window_bounds = array<i64: 256, 128>}, {pipeline_mode = #tpu.pipeline_mode<synchronous>, transform_indices = @transform_8, window_bounds = array<i64: 1, 128>}, {pipeline_mode = #tpu.pipeline_mode<synchronous>, transform_indices = @transform_9, window_bounds = array<i64: 128, 128>}, {pipeline_mode = #tpu.pipeline_mode<synchronous>, transform_indices = @transform_10, window_bounds = array<i64: 1, 128>}, {transform_indices = @transform_11, window_bounds = array<i64: 8, 128>}]} {
    %c0 = arith.constant 0 : index
    %c0_0 = arith.constant 0 : index
    %0 = vector.load %arg1[%c0, %c0_0] : memref<8x19xf32, #tpu.memory_space<vmem>>, vector<8x19xf32>
    %1 = arith.truncf %0 : vector<8x19xf32> to vector<8x19xbf16>
    %c0_1 = arith.constant 0 : index
    %c0_2 = arith.constant 0 : index
    %2 = vector.load %arg2[%c0_1, %c0_2] : memref<19x256xbf16, #tpu.memory_space<vmem>>, vector<19x256xbf16>
    %cst = arith.constant dense<0.000000e+00> : vector<8x256xf32>
    %3 = tpu.matmul %1, %2, %cst {dimension_numbers = #tpu.dot_dimension_numbers<[1], [0], [0], [1], [0, 0, 1, 1], [], []>} : vector<8x19xbf16>, vector<19x256xbf16>, vector<8x256xf32> -> vector<8x256xf32>
    %c0_3 = arith.constant 0 : index
    %c0_4 = arith.constant 0 : index
    %4 = vector.load %arg3[%c0_3, %c0_4] : memref<1x256xf32, #tpu.memory_space<vmem>>, vector<1x256xf32>
    %5 = vector.broadcast %4 : vector<1x256xf32> to vector<8x256xf32>
    %6 = arith.addf %3, %5 : vector<8x256xf32>
    %cst_5 = arith.constant 0.000000e+00 : f32
    %7 = vector.broadcast %cst_5 : f32 to vector<8x256xf32>
    %8 = arith.cmpf ogt, %6, %7 : vector<8x256xf32>
    %cst_6 = arith.constant 0.00999999977 : f32
    %9 = vector.broadcast %cst_6 : f32 to vector<8x256xf32>
    %10 = arith.mulf %9, %6 : vector<8x256xf32>
    %11 = arith.select %8, %6, %10 : vector<8x256xi1>, vector<8x256xf32>
    %12 = arith.truncf %11 : vector<8x256xf32> to vector<8x256xbf16>
    %c0_7 = arith.constant 0 : index
    %c0_8 = arith.constant 0 : index
    %13 = vector.load %arg4[%c0_7, %c0_8] : memref<256x512xbf16, #tpu.memory_space<vmem>>, vector<256x512xbf16>
    %cst_9 = arith.constant dense<0.000000e+00> : vector<8x512xf32>
    %14 = tpu.matmul %12, %13, %cst_9 {dimension_numbers = #tpu.dot_dimension_numbers<[1], [0], [0], [1], [0, 0, 1, 1], [], []>} : vector<8x256xbf16>, vector<256x512xbf16>, vector<8x512xf32> -> vector<8x512xf32>
    %c0_10 = arith.constant 0 : index
    %c0_11 = arith.constant 0 : index
    %15 = vector.load %arg5[%c0_10, %c0_11] : memref<1x512xf32, #tpu.memory_space<vmem>>, vector<1x512xf32>
    %16 = vector.broadcast %15 : vector<1x512xf32> to vector<8x512xf32>
    %17 = arith.addf %14, %16 : vector<8x512xf32>
    %cst_12 = arith.constant 0.000000e+00 : f32
    %18 = vector.broadcast %cst_12 : f32 to vector<8x512xf32>
    %19 = arith.cmpf ogt, %17, %18 : vector<8x512xf32>
    %cst_13 = arith.constant 0.00999999977 : f32
    %20 = vector.broadcast %cst_13 : f32 to vector<8x512xf32>
    %21 = arith.mulf %20, %17 : vector<8x512xf32>
    %22 = arith.select %19, %17, %21 : vector<8x512xi1>, vector<8x512xf32>
    %23 = arith.truncf %22 : vector<8x512xf32> to vector<8x512xbf16>
    %c0_14 = arith.constant 0 : index
    %c0_15 = arith.constant 0 : index
    %24 = vector.load %arg6[%c0_14, %c0_15] : memref<512x256xbf16, #tpu.memory_space<vmem>>, vector<512x256xbf16>
    %cst_16 = arith.constant dense<0.000000e+00> : vector<8x256xf32>
    %25 = tpu.matmul %23, %24, %cst_16 {dimension_numbers = #tpu.dot_dimension_numbers<[1], [0], [0], [1], [0, 0, 1, 1], [], []>} : vector<8x512xbf16>, vector<512x256xbf16>, vector<8x256xf32> -> vector<8x256xf32>
    %c0_17 = arith.constant 0 : index
    %c0_18 = arith.constant 0 : index
    %26 = vector.load %arg7[%c0_17, %c0_18] : memref<1x256xf32, #tpu.memory_space<vmem>>, vector<1x256xf32>
    %27 = vector.broadcast %26 : vector<1x256xf32> to vector<8x256xf32>
    %28 = arith.addf %25, %27 : vector<8x256xf32>
    %cst_19 = arith.constant 0.000000e+00 : f32
    %29 = vector.broadcast %cst_19 : f32 to vector<8x256xf32>
    %30 = arith.cmpf ogt, %28, %29 : vector<8x256xf32>
    %cst_20 = arith.constant 0.00999999977 : f32
    %31 = vector.broadcast %cst_20 : f32 to vector<8x256xf32>
    %32 = arith.mulf %31, %28 : vector<8x256xf32>
    %33 = arith.select %30, %28, %32 : vector<8x256xi1>, vector<8x256xf32>
    %34 = arith.truncf %33 : vector<8x256xf32> to vector<8x256xbf16>
    %c0_21 = arith.constant 0 : index
    %c0_22 = arith.constant 0 : index
    %35 = vector.load %arg8[%c0_21, %c0_22] : memref<256x128xbf16, #tpu.memory_space<vmem>>, vector<256x128xbf16>
    %cst_23 = arith.constant dense<0.000000e+00> : vector<8x128xf32>
    %36 = tpu.matmul %34, %35, %cst_23 {dimension_numbers = #tpu.dot_dimension_numbers<[1], [0], [0], [1], [0, 0, 1, 1], [], []>} : vector<8x256xbf16>, vector<256x128xbf16>, vector<8x128xf32> -> vector<8x128xf32>
    %c0_24 = arith.constant 0 : index
    %c0_25 = arith.constant 0 : index
    %37 = vector.load %arg9[%c0_24, %c0_25] : memref<1x128xf32, #tpu.memory_space<vmem>>, vector<1x128xf32>
    %38 = vector.broadcast %37 : vector<1x128xf32> to vector<8x128xf32>
    %39 = arith.addf %36, %38 : vector<8x128xf32>
    %cst_26 = arith.constant 0.000000e+00 : f32
    %40 = vector.broadcast %cst_26 : f32 to vector<8x128xf32>
    %41 = arith.cmpf ogt, %39, %40 : vector<8x128xf32>
    %cst_27 = arith.constant 0.00999999977 : f32
    %42 = vector.broadcast %cst_27 : f32 to vector<8x128xf32>
    %43 = arith.mulf %42, %39 : vector<8x128xf32>
    %44 = arith.select %41, %39, %43 : vector<8x128xi1>, vector<8x128xf32>
    %45 = arith.truncf %44 : vector<8x128xf32> to vector<8x128xbf16>
    %c0_28 = arith.constant 0 : index
    %c0_29 = arith.constant 0 : index
    %46 = vector.load %arg10[%c0_28, %c0_29] : memref<128x128xbf16, #tpu.memory_space<vmem>>, vector<128x128xbf16>
    %cst_30 = arith.constant dense<0.000000e+00> : vector<8x128xf32>
    %47 = tpu.matmul %45, %46, %cst_30 {dimension_numbers = #tpu.dot_dimension_numbers<[1], [0], [0], [1], [0, 0, 1, 1], [], []>} : vector<8x128xbf16>, vector<128x128xbf16>, vector<8x128xf32> -> vector<8x128xf32>
    %c0_31 = arith.constant 0 : index
    %c0_32 = arith.constant 0 : index
    %48 = vector.load %arg11[%c0_31, %c0_32] : memref<1x128xf32, #tpu.memory_space<vmem>>, vector<1x128xf32>
    %49 = vector.broadcast %48 : vector<1x128xf32> to vector<8x128xf32>
    %50 = arith.addf %47, %49 : vector<8x128xf32>
    %51 = arith.truncf %50 : vector<8x128xf32> to vector<8x128xbf16>
    %c0_33 = arith.constant 0 : index
    %c0_34 = arith.constant 0 : index
    %52 = vector.load %arg12[%c0_33, %c0_34] : memref<8x128xbf16, #tpu.memory_space<vmem>>, vector<8x128xbf16>
    tpu.vector_store %arg12[%c0_33, %c0_34], %51 {strides = array<i32>} : memref<8x128xbf16, #tpu.memory_space<vmem>>, vector<8x128xbf16>,
    return
  }
  func.func @transform_0(%arg0: i32) -> (i32, i32) {
    %c0_i32 = arith.constant 0 : i32
    %c0_i32_0 = arith.constant 0 : i32
    return %arg0, %c0_i32 : i32, i32
  }
  func.func @transform_1(%arg0: i32) -> (i32, i32) {
    %c0_i32 = arith.constant 0 : i32
    %c0_i32_0 = arith.constant 0 : i32
    %c0_i32_1 = arith.constant 0 : i32
    return %c0_i32, %c0_i32_0 : i32, i32
  }
  func.func @transform_2(%arg0: i32) -> (i32, i32) {
    %c0_i32 = arith.constant 0 : i32
    %c0_i32_0 = arith.constant 0 : i32
    %c0_i32_1 = arith.constant 0 : i32
    return %c0_i32, %c0_i32_0 : i32, i32
  }
  func.func @transform_3(%arg0: i32) -> (i32, i32) {
    %c0_i32 = arith.constant 0 : i32
    %c0_i32_0 = arith.constant 0 : i32
    %c0_i32_1 = arith.constant 0 : i32
    return %c0_i32, %c0_i32_0 : i32, i32
  }
  func.func @transform_4(%arg0: i32) -> (i32, i32) {
    %c0_i32 = arith.constant 0 : i32
    %c0_i32_0 = arith.constant 0 : i32
    %c0_i32_1 = arith.constant 0 : i32
    return %c0_i32, %c0_i32_0 : i32, i32
  }
  func.func @transform_5(%arg0: i32) -> (i32, i32) {
    %c0_i32 = arith.constant 0 : i32
    %c0_i32_0 = arith.constant 0 : i32
    %c0_i32_1 = arith.constant 0 : i32
    return %c0_i32, %c0_i32_0 : i32, i32
  }
  func.func @transform_6(%arg0: i32) -> (i32, i32) {
    %c0_i32 = arith.constant 0 : i32
    %c0_i32_0 = arith.constant 0 : i32
    %c0_i32_1 = arith.constant 0 : i32
    return %c0_i32, %c0_i32_0 : i32, i32
  }
  func.func @transform_7(%arg0: i32) -> (i32, i32) {
    %c0_i32 = arith.constant 0 : i32
    %c0_i32_0 = arith.constant 0 : i32
    %c0_i32_1 = arith.constant 0 : i32
    return %c0_i32, %c0_i32_0 : i32, i32
  }
  func.func @transform_8(%arg0: i32) -> (i32, i32) {
    %c0_i32 = arith.constant 0 : i32
    %c0_i32_0 = arith.constant 0 : i32
    %c0_i32_1 = arith.constant 0 : i32
    return %c0_i32, %c0_i32_0 : i32, i32
  }
  func.func @transform_9(%arg0: i32) -> (i32, i32) {
    %c0_i32 = arith.constant 0 : i32
    %c0_i32_0 = arith.constant 0 : i32
    %c0_i32_1 = arith.constant 0 : i32
    return %c0_i32, %c0_i32_0 : i32, i32
  }
  func.func @transform_10(%arg0: i32) -> (i32, i32) {
    %c0_i32 = arith.constant 0 : i32
    %c0_i32_0 = arith.constant 0 : i32
    %c0_i32_1 = arith.constant 0 : i32
    return %c0_i32, %c0_i32_0 : i32, i32
  }
  func.func @transform_11(%arg0: i32) -> (i32, i32) {
    %c0_i32 = arith.constant 0 : i32
    %c0_i32_0 = arith.constant 0 : i32
    return %arg0, %c0_i32 : i32, i32
  }
}

</mosaic_0001>

<bundles_post_ra>
// kernel: net_forward.1
= control target key start
LH: loop header
LB: loop body
LE: loop exit
PB: predicated region body
PF: predicated region fallthrough
CT: control target
= control target key end

     0   :  { %16 = vsyncpa [#allocation3], 0  ;;  %s2462_s0 = inlined_call_operand.vmem [shape: f32[8,19], index: 0, kind: input, shape index: {}]   ;;  %s2463_s1 = inlined_call_operand.vmem [shape: bf16[19,256], index: 1, kind: input, shape index: {}]   ;;  %s2464_s2 = inlined_call_operand.vmem [shape: f32[1,256], index: 2, kind: input, shape index: {}]   ;;  %s2465_s3 = inlined_call_operand.hbm [shape: bf16[256,512], index: 3, kind: input, shape index: {}]   ;;  %s2466_s4 = inlined_call_operand.vmem [shape: f32[1,512], index: 4, kind: input, shape index: {}]   ;;  %s2467_s5 = inlined_call_operand.hbm [shape: bf16[512,256], index: 5, kind: input, shape index: {}]   ;;  %s2468_s6 = inlined_call_operand.vmem [shape: f32[1,256], index: 6, kind: input, shape index: {}]   ;;  %s2469_s7 = inlined_call_operand.hbm [shape: bf16[256,128], index: 7, kind: input, shape index: {}]   ;;  %s2470_s8 = inlined_call_operand.vmem [shape: f32[1,128], index: 8, kind: input, shape index: {}]   ;;  %s2471_s9 = inlined_call_operand.hbm [shape: bf16[128,128], index: 9, kind: input, shape index: {}]   ;;  %s2472_s10 = inlined_call_operand.vmem [shape: f32[1,128], index: 10, kind: input, shape index: {}]   ;;  %s2473_s11 = inlined_call_operand.vmem [shape: bf16[8,128], index: 11, kind: output, shape index: {}]  }
   0x1   :  { %17 = vsyncpa [#allocation5], 0  ;;  %s44_s19 = sshll.u32 %s2467_s5, 4  ;;  %s45_s19 = int_to_ptr.hbm [resolvable:$true] %s44_s19 }
   0x2   :  { %18 = vsyncpa [#allocation8], 0  ;;  %s2331_s20 = smov [#allocation4]   ;;  %s29_s24 = sshll.u32 %s2465_s3, 4  ;;  %s30_s24 = int_to_ptr.hbm [resolvable:$true] %s29_s24 }
   0x3   :  { %s46_s21 = sshll.u32 %s2331_s20, 4  ;;  %s2332_s25 = smov 128   ;;  %s47_s21 = int_to_ptr.vmem [resolvable:$true] %s46_s21 }
   0x4   :  { %s2333_s26 = smov 8   ;;  %s2334_s27 = smov [#allocation2]  }
   0x5   :  { %52 = dma.hbm_to_vmem [thread:$0]  %s45_s19, 8192, %s47_s21, [#allocation5], %s2332_s25, %s2332_s25, %s2333_s26  }
   0x6   :  { %s31_s28 = sshll.u32 %s2334_s27, 4  ;;  %s2335_s29 = smov 256   ;;  %s32_s28 = int_to_ptr.vmem [resolvable:$true] %s31_s28 }
   0x7   :  { %s2336_s30 = smov 16   ;;  %s59_s13 = sshll.u32 %s2469_s7, 4  ;;  %s60_s13 = int_to_ptr.hbm [resolvable:$true] %s59_s13 }
   0x8   :  { %37 = dma.hbm_to_vmem [thread:$0]  %s30_s24, 8192, %s32_s28, [#allocation3], %s2335_s29, %s2335_s29, %s2336_s30  }
   0x9   :  { %s2337_s14 = smov [#allocation6]   ;;  %s74_s17 = sshll.u32 %s2471_s9, 4  ;;  %s75_s17 = int_to_ptr.hbm [resolvable:$true] %s74_s17 }
   0xa   :  { %s61_s15 = sshll.u32 %s2337_s14, 4  ;;  %s2338_s18 = smov 64   ;;  %s62_s15 = int_to_ptr.vmem [resolvable:$true] %s61_s15 }
   0xb   :  { %s2339_s19 = smov 4   ;;  %s2340_s20 = smov [#allocation7]  }
   0xc   :  { %67 = dma.hbm_to_vmem [thread:$0]  %s60_s13, 2048, %s62_s15, [#allocation5], %s2338_s18, %s2338_s18, %s2339_s19  }
   0xd   :  { %s76_s21 = sshll.u32 %s2340_s20, 4  ;;  %s77_s21 = int_to_ptr.vmem [resolvable:$true] %s76_s21 }
   0xe   :  { %82 = dma.hbm_to_vmem [thread:$0]  %s75_s17, 1024, %s77_s21, [#allocation8], %s2338_s18, %s2338_s18, %s2339_s19  }
   0xf   :  { %2325 = dma.done.wait [#allocation3], 8192  }
  0x10   :  { %2326 = vsyncadd [#allocation3], 4294959104 }
  0x11   :  { %2327 = dma.done.wait [#allocation5], 10240  }
  0x12   :  { %2328 = vsyncadd [#allocation5], 4294957056 }
  0x13   :  { %2329 = dma.done.wait [#allocation8], 1024  }
  0x14   :  { %2330 = vsyncadd [#allocation8], 4294966272  ;;  %vm132_vm0 = vcmask 1040384   ;;  %vm133_vm1 = vcmask 1041408   ;;  %v2341_v0 = vmov 65535   ;;  %v102_v26 = vld [vmem:[%s2462_s0] sm:$0xff] }
  0x15   :  { %v134_v1 = vsel %vm132_vm0, 4294967295, %v2341_v0  ;;  %v106_v2 = vld [vmem:[%s2463_s1 + $0x10] sm:$0x33]  ;;  %v1446_v6 = vld [vmem:[%s2463_s1] sm:$0xf]  ;;  %vm128_vm2 = vcmask 154624   ;;  %v2432_v38 = vpack.c.bf16 %v102_v26, %v102_v26 }
  0x16   :  { %v120_v3 = vunpack.c.l.b16 %v106_v2  ;;  %v135_v4 = vsel %vm133_vm1, %v134_v1, 0  ;;  %v121_v5 = vunpack.c.h.b16 %v106_v2  ;;  %v1568_v7 = vld [vmem:[#allocation2 + $0xe0] sm:$0xf]  ;;  %v2094_v8 = vld [vmem:[#allocation2 + $0xec] sm:$0xf0] }
  0x17   :  { %v2092_v9 = vld [vmem:[#allocation2 + $0xe4] sm:$0xf]  ;;  %v1569_v11 = vor.u32 %v2094_v8, %v1568_v7  ;;  %v1570_v12 = vld [vmem:[#allocation2 + $0xf0] sm:$0xf0]  ;;  %v1552_v13 = vld [vmem:[#allocation2 + $0xc0] sm:$0xf] }
  0x18   :  { %v124_v10 = vpack.c.b16 %v120_v3, %v120_v3  ;;  %v2090_v14 = vld [vmem:[#allocation2 + $0xcc] sm:$0xf0]  ;;  %v2063_v15 = vld [vmem:[%s2463_s1 + $0x4] sm:$0xf0]  ;;  %v125_v16 = vpack.c.b16 %v121_v5, %v121_v5  ;;  %v1573_v17 = vor.u32 %v2092_v9, %v1570_v12  ;;  %v2088_v18 = vld [vmem:[#allocation2 + $0xc4] sm:$0xf] }
  0x19   :  { %v1554_v19 = vld [vmem:[#allocation2 + $0xd0] sm:$0xf0]  ;;  %570 = vmatpush.bf16.msra.mxu2 %v1569_v11  ;;  %v1553_v21 = vor.u32 %v2090_v14, %v1552_v13  ;;  %v1536_v23 = vld [vmem:[#allocation2 + $0xa0] sm:$0xf]  ;;  %v2086_v24 = vld [vmem:[#allocation2 + $0xac] sm:$0xf0]  ;;  %v1447_v25 = vor.u32 %v2063_v15, %v1446_v6 }
  0x1a   :  { %v137_v20 = vand.u32 %v135_v4, %v124_v10  ;;  %596 = vmatpush.bf16.msra.mxu0 %v1573_v17  ;;  %v1557_v22 = vor.u32 %v2088_v18, %v1554_v19  ;;  %v2084_v27 = vld [vmem:[#allocation2 + $0xa4] sm:$0xf]  ;;  %v1538_v28 = vld [vmem:[#allocation2 + $0xb0] sm:$0xf0]  ;;  %v140_v29 = vand.u32 %v135_v4, %v125_v16  ;;  %v1696_v31 = vld [vmem:[#allocation2 + $0x1e0] sm:$0xf]  ;;  %v1537_v34 = vor.u32 %v2086_v24, %v1536_v23 }
  0x1b   :  { %v2062_v30 = vld [vmem:[%s2463_s1 + $0x4] sm:$0xf]  ;;  %v2126_v32 = vld [vmem:[#allocation2 + $0x1ec] sm:$0xf0]  ;;  %v1448_v33 = vld [vmem:[%s2463_s1 + $0x8] sm:$0xf0]  ;;  %v1541_v39 = vor.u32 %v2084_v27, %v1538_v28 }
  0x1c   :  { %148 = vmatpush.bf16.msra.mxu1 %v137_v20  ;;  %v1520_v35 = vld [vmem:[#allocation2 + $0x80] sm:$0xf]  ;;  %v2082_v36 = vld [vmem:[#allocation2 + $0x8c] sm:$0xf0]  ;;  %v1697_v37 = vor.u32 %v2126_v32, %v1696_v31  ;;  %v2124_v40 = vld [vmem:[#allocation2 + $0x1e4] sm:$0xf]  ;;  %v1451_v46 = vor.u32 %v2062_v30, %v1448_v33 }
  0x1d   :  { %571 = vmatpush.bf16.msra.mxu2 %v1553_v21  ;;  %v1698_v41 = vld [vmem:[#allocation2 + $0x1f0] sm:$0xf0]  ;;  %v1680_v42 = vld [vmem:[#allocation2 + $0x1c0] sm:$0xf]  ;;  %v2080_v43 = vld [vmem:[#allocation2 + $0x84] sm:$0xf]  ;;  %v1521_v48 = vor.u32 %v2082_v36, %v1520_v35 }
  0x1e   :  { %597 = vmatpush.bf16.msra.mxu0 %v1557_v22  ;;  %v1522_v44 = vld [vmem:[#allocation2 + $0x90] sm:$0xf0]  ;;  %583 = vmatpush.bf16.msra.mxu3 %v1697_v37  ;;  %v2122_v45 = vld [vmem:[#allocation2 + $0x1cc] sm:$0xf0]  ;;  %v1504_v49 = vld [vmem:[#allocation2 + $0x60] sm:$0xf]  ;;  %v1701_v50 = vor.u32 %v2124_v40, %v1698_v41 }
  0x1f   :  { %v1681_v47 = vor.u32 %v2122_v45, %v1680_v42  ;;  %v1664_v51 = vld [vmem:[#allocation2 + $0x1a0] sm:$0xf]  ;;  %v2118_v52 = vld [vmem:[#allocation2 + $0x1ac] sm:$0xf0]  ;;  %v1525_v53 = vor.u32 %v2080_v43, %v1522_v44  ;;  %v2120_v55 = vld [vmem:[#allocation2 + $0x1c4] sm:$0xf] }
  0x20   :  { %149 = vmatpush.bf16.msra.mxu1 %v1447_v25  ;;  %v2078_v54 = vld [vmem:[#allocation2 + $0x6c] sm:$0xf0]  ;;  %v1682_v56 = vld [vmem:[#allocation2 + $0x1d0] sm:$0xf0]  ;;  %v2076_v57 = vld [vmem:[#allocation2 + $0x64] sm:$0xf]  ;;  %v1665_v59 = vor.u32 %v2118_v52, %v1664_v51 }
  0x21   :  { %572 = vmatpush.bf16.msra.mxu2 %v1537_v34  ;;  %v1506_v58 = vld [vmem:[#allocation2 + $0x70] sm:$0xf0]  ;;  %v1648_v60 = vld [vmem:[#allocation2 + $0x180] sm:$0xf]  ;;  %v2114_v61 = vld [vmem:[#allocation2 + $0x18c] sm:$0xf0]  ;;  %v1505_v62 = vor.u32 %v2078_v54, %v1504_v49  ;;  %v1685_v0 = vor.u32 %v2120_v55, %v1682_v56 }
  0x22   :  { %598 = vmatpush.bf16.msra.mxu0 %v1541_v39  ;;  %584 = vmatpush.bf16.msra.mxu3 %v1681_v47  ;;  %v1488_v63 = vld [vmem:[#allocation2 + $0x40] sm:$0xf]  ;;  %v1509_v1 = vor.u32 %v2076_v57, %v1506_v58  ;;  %v2074_v2 = vld [vmem:[#allocation2 + $0x4c] sm:$0xf0]  ;;  %v2116_v3 = vld [vmem:[#allocation2 + $0x1a4] sm:$0xf]  ;;  %v1649_v7 = vor.u32 %v2114_v61, %v1648_v60 }
  0x23   :  { %1452 = vmatmul.msk.bf16.vlgmr.msra.gmra.mxu1 %vm128_vm2, %v2432_v38  ;;  %v1666_v4 = vld [vmem:[#allocation2 + $0x1b0] sm:$0xf0]  ;;  %v2072_v5 = vld [vmem:[#allocation2 + $0x44] sm:$0xf]  ;;  %v1632_v8 = vld [vmem:[#allocation2 + $0x160] sm:$0xf]  ;;  %v1489_v10 = vor.u32 %v2074_v2, %v1488_v63 }
  0x24   :  { %161 = vmatpush.bf16.msrb.mxu1 %v140_v29  ;;  %v1490_v6 = vld [vmem:[#allocation2 + $0x50] sm:$0xf0]  ;;  %v2110_v9 = vld [vmem:[#allocation2 + $0x16c] sm:$0xf0]  ;;  %v1472_v11 = vld [vmem:[#allocation2 + $0x20] sm:$0xf]  ;;  %v1669_v13 = vor.u32 %v2116_v3, %v1666_v4 }
  0x25   :  { %573 = vmatpush.bf16.msra.mxu2 %v1521_v48  ;;  %v2070_v12 = vld [vmem:[#allocation2 + $0x2c] sm:$0xf0]  ;;  %v2112_v14 = vld [vmem:[#allocation2 + $0x184] sm:$0xf]  ;;  %v1493_v15 = vor.u32 %v2072_v5, %v1490_v6  ;;  %v1650_v16 = vld [vmem:[#allocation2 + $0x190] sm:$0xf0]  ;;  %v1633_v19 = vor.u32 %v2110_v9, %v1632_v8 }
  0x26   :  { %599 = vmatpush.bf16.msra.mxu0 %v1525_v53  ;;  %585 = vmatpush.bf16.msra.mxu3 %v1665_v59  ;;  %v2068_v17 = vld [vmem:[#allocation2 + $0x24] sm:$0xf]  ;;  %v1474_v18 = vld [vmem:[#allocation2 + $0x30] sm:$0xf0]  ;;  %v1473_v20 = vor.u32 %v2070_v12, %v1472_v11  ;;  %v1456_v21 = vld [vmem:[#allocation2] sm:$0xf]  ;;  %v1653_v23 = vor.u32 %v2112_v14, %v1650_v16 }
  0x27   :  { %v2066_v22 = vld [vmem:[#allocation2 + $0xc] sm:$0xf0]  ;;  %v1477_v24 = vor.u32 %v2068_v17, %v1474_v18  ;;  %v2064_v25 = vld [vmem:[#allocation2 + $0x4] sm:$0xf]  ;;  %v1634_v27 = vld [vmem:[#allocation2 + $0x170] sm:$0xf0] }
  0x28   :  { %162 = vmatpush.bf16.msrb.mxu1 %v1451_v46  ;;  %v2108_v26 = vld [vmem:[#allocation2 + $0x164] sm:$0xf]  ;;  %v1458_v28 = vld [vmem:[#allocation2 + $0x10] sm:$0xf0]  ;;  %v1576_v29 = vld [vmem:[#allocation2 + $0xe8] sm:$0xf]  ;;  %v1457_v33 = vor.u32 %v2066_v22, %v1456_v21 }
  0x29   :  { %574 = vmatpush.bf16.msra.mxu2 %v1505_v62  ;;  %v2095_v30 = vld [vmem:[#allocation2 + $0xf4] sm:$0xf0]  ;;  %v2093_v31 = vld [vmem:[#allocation2 + $0xec] sm:$0xf]  ;;  %v1578_v32 = vld [vmem:[#allocation2 + $0xf8] sm:$0xf0]  ;;  %v1637_v34 = vor.u32 %v2108_v26, %v1634_v27  ;;  %v1461_v35 = vor.u32 %v2064_v25, %v1458_v28 }
  0x2a   :  { %600 = vmatpush.bf16.msra.mxu0 %v1509_v1  ;;  %586 = vmatpush.bf16.msra.mxu3 %v1649_v7  ;;  %v1577_v36 = vor.u32 %v2095_v30, %v1576_v29  ;;  %v1581_v37 = vor.u32 %v2093_v31, %v1578_v32  ;;  %v1560_v39 = vld [vmem:[#allocation2 + $0xc8] sm:$0xf]  ;;  %v2091_v40 = vld [vmem:[#allocation2 + $0xd4] sm:$0xf0]  ;;  %v2089_v41 = vld [vmem:[#allocation2 + $0xcc] sm:$0xf] }
  0x2b   :  { %v1562_v42 = vld [vmem:[#allocation2 + $0xd8] sm:$0xf0]  ;;  %v1561_v43 = vor.u32 %v2091_v40, %v1560_v39  ;;  %v1616_v45 = vld [vmem:[#allocation2 + $0x140] sm:$0xf]  ;;  %v2106_v46 = vld [vmem:[#allocation2 + $0x14c] sm:$0xf0] }
  0x2c   :  { %609 = vmatpush.bf16.msra.mxu1 %v1701_v50  ;;  %v1565_v44 = vor.u32 %v2089_v41, %v1562_v42  ;;  %v1617_v47 = vor.u32 %v2106_v46, %v1616_v45  ;;  %v1618_v48 = vld [vmem:[#allocation2 + $0x150] sm:$0xf0]  ;;  %v1544_v49 = vld [vmem:[#allocation2 + $0xa8] sm:$0xf]  ;;  %v2087_v50 = vld [vmem:[#allocation2 + $0xb4] sm:$0xf0] }
  0x2d   :  { %575 = vmatpush.bf16.msra.mxu2 %v1489_v10  ;;  %v1545_v52 = vor.u32 %v2087_v50, %v1544_v49  ;;  %v2085_v53 = vld [vmem:[#allocation2 + $0xac] sm:$0xf]  ;;  %v1546_v54 = vld [vmem:[#allocation2 + $0xb8] sm:$0xf0]  ;;  %v1600_v56 = vld [vmem:[#allocation2 + $0x120] sm:$0xf] }
  0x2e   :  { %601 = vmatpush.bf16.msra.mxu0 %v1493_v15  ;;  %587 = vmatpush.bf16.msra.mxu3 %v1633_v19  ;;  %v1549_v55 = vor.u32 %v2085_v53, %v1546_v54  ;;  %v2102_v57 = vld [vmem:[#allocation2 + $0x12c] sm:$0xf0]  ;;  %v2100_v58 = vld [vmem:[#allocation2 + $0x124] sm:$0xf]  ;;  %v1602_v60 = vld [vmem:[#allocation2 + $0x130] sm:$0xf0] }
  0x2f   :  { %v1601_v59 = vor.u32 %v2102_v57, %v1600_v56  ;;  %v1528_v61 = vld [vmem:[#allocation2 + $0x88] sm:$0xf]  ;;  %v2083_v62 = vld [vmem:[#allocation2 + $0x94] sm:$0xf0]  ;;  %v1605_v63 = vor.u32 %v2100_v58, %v1602_v60  ;;  %v2081_v1 = vld [vmem:[#allocation2 + $0x8c] sm:$0xf] }
  0x30   :  { %610 = vmatpush.bf16.msra.mxu1 %v1685_v0  ;;  %v1529_v0 = vor.u32 %v2083_v62, %v1528_v61  ;;  %v1530_v2 = vld [vmem:[#allocation2 + $0x98] sm:$0xf0]  ;;  %v1584_v4 = vld [vmem:[#allocation2 + $0x100] sm:$0xf]  ;;  %v2098_v5 = vld [vmem:[#allocation2 + $0x10c] sm:$0xf0] }
  0x31   :  { %576 = vmatpush.bf16.msra.mxu2 %v1473_v20  ;;  %v1533_v3 = vor.u32 %v2081_v1, %v1530_v2  ;;  %v2096_v6 = vld [vmem:[#allocation2 + $0x104] sm:$0xf]  ;;  %v1585_v7 = vor.u32 %v2098_v5, %v1584_v4  ;;  %v1586_v8 = vld [vmem:[#allocation2 + $0x110] sm:$0xf0]  ;;  %v1512_v9 = vld [vmem:[#allocation2 + $0x68] sm:$0xf] }
  0x32   :  { %602 = vmatpush.bf16.msra.mxu0 %v1477_v24  ;;  %588 = vmatpush.bf16.msra.mxu3 %v1617_v47  ;;  %v2079_v10 = vld [vmem:[#allocation2 + $0x74] sm:$0xf0]  ;;  %v1589_v11 = vor.u32 %v2096_v6, %v1586_v8  ;;  %v2077_v15 = vld [vmem:[#allocation2 + $0x6c] sm:$0xf]  ;;  %v1514_v17 = vld [vmem:[#allocation2 + $0x78] sm:$0xf0] }
  0x33   :  { %1453 = vmatmul.msk.bf16.vlgmr.msrb.gmra.mxu1 %vm128_vm2, %v2432_v38  ;;  %v2104_v38 = vld [vmem:[#allocation2 + $0x144] sm:$0xf]  ;;  %v1513_v12 = vor.u32 %v2079_v10, %v1512_v9  ;;  %v2127_v14 = vld [vmem:[#allocation2 + $0x1f4] sm:$0xf0]  ;;  %v2125_v18 = vld [vmem:[#allocation2 + $0x1ec] sm:$0xf]  ;;  %v1517_v20 = vor.u32 %v2077_v15, %v1514_v17 }
  0x34   :  { %611 = vmatpush.bf16.msra.mxu1 %v1669_v13  ;;  %v1621_v51 = vor.u32 %v2104_v38, %v1618_v48  ;;  %v1704_v13 = vld [vmem:[#allocation2 + $0x1e8] sm:$0xf]  ;;  %v1706_v19 = vld [vmem:[#allocation2 + $0x1f8] sm:$0xf0]  ;;  %v2123_v26 = vld [vmem:[#allocation2 + $0x1d4] sm:$0xf0] }
  0x35   :  { %577 = vmatpush.bf16.msra.mxu2 %v1457_v33  ;;  %v1705_v16 = vor.u32 %v2127_v14, %v1704_v13  ;;  %v1709_v21 = vor.u32 %v2125_v18, %v1706_v19  ;;  %v1496_v22 = vld [vmem:[#allocation2 + $0x48] sm:$0xf]  ;;  %v2073_v27 = vld [vmem:[#allocation2 + $0x4c] sm:$0xf]  ;;  %v1498_v28 = vld [vmem:[#allocation2 + $0x58] sm:$0xf0] }
  0x36   :  { %603 = vmatpush.bf16.msra.mxu0 %v1461_v35  ;;  %589 = vmatpush.bf16.msra.mxu3 %v1601_v59  ;;  %v1688_v24 = vld [vmem:[#allocation2 + $0x1c8] sm:$0xf]  ;;  %v1501_v30 = vor.u32 %v2073_v27, %v1498_v28  ;;  %v2121_v31 = vld [vmem:[#allocation2 + $0x1cc] sm:$0xf]  ;;  %v1690_v32 = vld [vmem:[#allocation2 + $0x1d8] sm:$0xf0] }
  0x37   :  { %v1689_v29 = vor.u32 %v2123_v26, %v1688_v24  ;;  %v1693_v33 = vor.u32 %v2121_v31, %v1690_v32  ;;  %v2071_v35 = vld [vmem:[#allocation2 + $0x34] sm:$0xf0]  ;;  %v2069_v40 = vld [vmem:[#allocation2 + $0x2c] sm:$0xf]  ;;  %v1482_v41 = vld [vmem:[#allocation2 + $0x38] sm:$0xf0] }
  0x38   :  { %612 = vmatpush.bf16.msra.mxu1 %v1653_v23  ;;  %v2075_v23 = vld [vmem:[#allocation2 + $0x54] sm:$0xf0]  ;;  %v1674_v45 = vld [vmem:[#allocation2 + $0x1b8] sm:$0xf0]  ;;  %v1464_v38 = vld [vmem:[#allocation2 + $0x8] sm:$0xf] }
  0x39   :  { %622 = vmatpush.bf16.msrb.mxu2 %v1577_v36  ;;  %v1497_v25 = vor.u32 %v2075_v23, %v1496_v22  ;;  %v1672_v36 = vld [vmem:[#allocation2 + $0x1a8] sm:$0xf]  ;;  %v2119_v39 = vld [vmem:[#allocation2 + $0x1b4] sm:$0xf0]  ;;  %v1658_v56 = vld [vmem:[#allocation2 + $0x198] sm:$0xf0] }
  0x3a   :  { %648 = vmatpush.bf16.msrb.mxu0 %v1581_v37  ;;  %590 = vmatpush.bf16.msra.mxu3 %v1585_v7  ;;  %v1673_v42 = vor.u32 %v2119_v39, %v1672_v36  ;;  %v2067_v47 = vld [vmem:[#allocation2 + $0x14] sm:$0xf0]  ;;  %v1656_v48 = vld [vmem:[#allocation2 + $0x188] sm:$0xf]  ;;  %v2109_v60 = vld [vmem:[#allocation2 + $0x16c] sm:$0xf] }
  0x3b   :  { %v1465_v49 = vor.u32 %v2067_v47, %v1464_v38  ;;  %v2115_v50 = vld [vmem:[#allocation2 + $0x194] sm:$0xf0]  ;;  %v1640_v58 = vld [vmem:[#allocation2 + $0x168] sm:$0xf]  ;;  %v1642_v62 = vld [vmem:[#allocation2 + $0x178] sm:$0xf0] }
  0x3c   :  { %613 = vmatpush.bf16.msra.mxu1 %v1637_v34  ;;  %v1480_v34 = vld [vmem:[#allocation2 + $0x28] sm:$0xf]  ;;  %v1657_v53 = vor.u32 %v2115_v50, %v1656_v48  ;;  %v2111_v59 = vld [vmem:[#allocation2 + $0x174] sm:$0xf0]  ;;  %v2105_v2 = vld [vmem:[#allocation2 + $0x14c] sm:$0xf] }
  0x3d   :  { %623 = vmatpush.bf16.msrb.mxu2 %v1561_v43  ;;  %v1481_v37 = vor.u32 %v2071_v35, %v1480_v34  ;;  %v1485_v43 = vor.u32 %v2069_v40, %v1482_v41  ;;  %v1641_v61 = vor.u32 %v2111_v59, %v1640_v58  ;;  %v2107_v1 = vld [vmem:[#allocation2 + $0x154] sm:$0xf0]  ;;  %v1626_v5 = vld [vmem:[#allocation2 + $0x158] sm:$0xf0]  ;;  %v1608_v7 = vld [vmem:[#allocation2 + $0x128] sm:$0xf] }
  0x3e   :  { %649 = vmatpush.bf16.msrb.mxu0 %v1565_v44  ;;  %635 = vmatpush.bf16.msrb.mxu3 %v1705_v16  ;;  %v2117_v44 = vld [vmem:[#allocation2 + $0x1ac] sm:$0xf]  ;;  %v1629_v6 = vor.u32 %v2105_v2, %v1626_v5  ;;  %v2103_v8 = vld [vmem:[#allocation2 + $0x134] sm:$0xf0]  ;;  %v1610_v10 = vld [vmem:[#allocation2 + $0x138] sm:$0xf0] }
  0x3f   :  { %v1677_v46 = vor.u32 %v2117_v44, %v1674_v45  ;;  %v2101_v9 = vld [vmem:[#allocation2 + $0x12c] sm:$0xf]  ;;  %v1592_v14 = vld [vmem:[#allocation2 + $0x108] sm:$0xf]  ;;  %v2099_v15 = vld [vmem:[#allocation2 + $0x114] sm:$0xf0] }
  0x40   :  { %614 = vmatpush.bf16.msra.mxu1 %v1621_v51  ;;  %v2065_v51 = vld [vmem:[#allocation2 + $0xc] sm:$0xf]  ;;  %v1613_v13 = vor.u32 %v2101_v9, %v1610_v10  ;;  %v1594_v18 = vld [vmem:[#allocation2 + $0x118] sm:$0xf0]  ;;  %v1768_v26 = vld [vmem:[#allocation4 + $0x70] sm:$0xf] }
  0x41   :  { %624 = vmatpush.bf16.msrb.mxu2 %v1545_v52  ;;  %v1466_v52 = vld [vmem:[#allocation2 + $0x18] sm:$0xf0]  ;;  %v2097_v17 = vld [vmem:[#allocation2 + $0x10c] sm:$0xf]  ;;  %v2143_v27 = vld [vmem:[#allocation4 + $0x74] sm:$0xf0] }
  0x42   :  { %650 = vmatpush.bf16.msrb.mxu0 %v1549_v55  ;;  %636 = vmatpush.bf16.msrb.mxu3 %v1689_v29  ;;  %v1469_v54 = vor.u32 %v2065_v51, %v1466_v52  ;;  %v2113_v55 = vld [vmem:[#allocation2 + $0x18c] sm:$0xf]  ;;  %v1597_v22 = vor.u32 %v2097_v17, %v1594_v18  ;;  %v1769_v28 = vor.u32 %v2143_v27, %v1768_v26  ;;  %v1760_v29 = vld [vmem:[#allocation4 + $0x60] sm:$0xf]  ;;  %v2139_v34 = vld [vmem:[#allocation4 + $0x54] sm:$0xf0] }
  0x43   :  { %v1661_v57 = vor.u32 %v2113_v55, %v1658_v56  ;;  %v1832_v39 = vld [vmem:[#allocation4 + $0xf0] sm:$0xf]  ;;  %v2159_v40 = vld [vmem:[#allocation4 + $0xf4] sm:$0xf0]  ;;  %v1744_v44 = vld [vmem:[#allocation4 + $0x40] sm:$0xf] }
  0x44   :  { %615 = vmatpush.bf16.msra.mxu1 %v1605_v63  ;;  %v1645_v63 = vor.u32 %v2109_v60, %v1642_v62  ;;  %v1960_v41 = vld [vmem:[#allocation4 + $0x1f0] sm:$0xf]  ;;  %v2137_v45 = vld [vmem:[#allocation4 + $0x44] sm:$0xf0]  ;;  %v1833_v47 = vor.u32 %v2159_v40, %v1832_v39  ;;  %v2155_v55 = vld [vmem:[#allocation4 + $0xd4] sm:$0xf0] }
  0x45   :  { %625 = vmatpush.bf16.msrb.mxu2 %v1529_v0  ;;  %v1624_v0 = vld [vmem:[#allocation2 + $0x148] sm:$0xf]  ;;  %v1745_v51 = vor.u32 %v2137_v45, %v1744_v44  ;;  %v1800_v60 = vld [vmem:[#allocation4 + $0xb0] sm:$0xf]  ;;  %v2175_v9 = vld [vmem:[#allocation4 + $0x174] sm:$0xf0] }
  0x46   :  { %651 = vmatpush.bf16.msrb.mxu0 %v1533_v3  ;;  %637 = vmatpush.bf16.msrb.mxu3 %v1673_v42  ;;  %v107_v3 = vld [vmem:[%s2464_s2] sm:$0x3]  ;;  %v1625_v4 = vor.u32 %v2107_v1, %v1624_v0  ;;  %v2157_v50 = vld [vmem:[#allocation4 + $0xe4] sm:$0xf0]  ;;  %v1736_v5 = vld [vmem:[#allocation4 + $0x30] sm:$0xf] }
  0x47   :  { %v110_v32 = vperm.slane %v107_v3, 1  ;;  %v2153_v58 = vld [vmem:[#allocation4 + $0xc4] sm:$0xf0]  ;;  %v1952_v1 = vld [vmem:[#allocation4 + $0x1e0] sm:$0xf] }
  0x48   :  { %616 = vmatpush.bf16.msra.mxu1 %v1589_v11  ;;  %v109_v11 = vperm.slane %v107_v3, 0  ;;  %v2149_v0 = vld [vmem:[#allocation4 + $0xa4] sm:$0xf0]  ;;  %v1784_v10 = vld [vmem:[#allocation4 + $0x90] sm:$0xf] }
  0x49   :  { %626 = vmatpush.bf16.msrb.mxu2 %v1513_v12  ;;  %v1609_v12 = vor.u32 %v2103_v8, %v1608_v7  ;;  %v2189_v3 = vld [vmem:[#allocation4 + $0x1e4] sm:$0xf0]  ;;  %v1896_v7 = vld [vmem:[#allocation4 + $0x170] sm:$0xf]  ;;  %v1728_v17 = vld [vmem:[#allocation4 + $0x20] sm:$0xf] }
  0x4a   :  { %652 = vmatpush.bf16.msrb.mxu0 %v1517_v20  ;;  %638 = vmatpush.bf16.msrb.mxu3 %v1657_v53  ;;  %v1593_v20 = vor.u32 %v2099_v15, %v1592_v14  ;;  %v1944_v14 = vld [vmem:[#allocation4 + $0x1d0] sm:$0xf]  ;;  %v2187_v15 = vld [vmem:[#allocation4 + $0x1d4] sm:$0xf0]  ;;  %v2133_v18 = vld [vmem:[#allocation4 + $0x24] sm:$0xf0] }
  0x4b   :  { %v2185_v27 = vld [vmem:[#allocation4 + $0x1c4] sm:$0xf0]  ;;  %v2183_v39 = vld [vmem:[#allocation4 + $0x1b4] sm:$0xf0]  ;;  %v1712_v45 = vld [vmem:[#allocation4] sm:$0xf] }
  0x4c   :  { %661 = vmatpush.bf16.msrb.mxu1 %v1709_v21 }
  0x4d   :  { %627 = vmatpush.bf16.msrb.mxu2 %v1497_v25 }
  0x4e   :  { %653 = vmatpush.bf16.msrb.mxu0 %v1501_v30  ;;  %639 = vmatpush.bf16.msrb.mxu3 %v1641_v61  ;;  %v2141_v30 = vld [vmem:[#allocation4 + $0x64] sm:$0xf0]  ;;  %v2151_v61 = vld [vmem:[#allocation4 + $0xb4] sm:$0xf0] }
  0x4f   :  { %v1761_v31 = vor.u32 %v2141_v30, %v1760_v29  ;;  %v1801_v62 = vor.u32 %v2151_v61, %v1800_v60  ;;  %v1834_v29 = vld [vmem:[#allocation4 + $0xf8] sm:$0xf0]  ;;  %v2167_v60 = vld [vmem:[#allocation4 + $0x134] sm:$0xf0] }
  0x50   :  { %662 = vmatpush.bf16.msrb.mxu1 %v1693_v33  ;;  %v1752_v33 = vld [vmem:[#allocation4 + $0x50] sm:$0xf] }
  0x51   :  { %628 = vmatpush.bf16.msrb.mxu2 %v1481_v37  ;;  %v1753_v36 = vor.u32 %v2139_v34, %v1752_v33  ;;  %v2131_v33 = vld [vmem:[#allocation4 + $0x14] sm:$0xf0]  ;;  %v1880_v34 = vld [vmem:[#allocation4 + $0x150] sm:$0xf] }
  0x52   :  { %654 = vmatpush.bf16.msrb.mxu0 %v1485_v43  ;;  %640 = vmatpush.bf16.msrb.mxu3 %v1625_v4  ;;  %v2191_v43 = vld [vmem:[#allocation4 + $0x1f4] sm:$0xf0]  ;;  %v1953_v4 = vor.u32 %v2189_v3, %v1952_v1  ;;  %v1912_v1 = vld [vmem:[#allocation4 + $0x190] sm:$0xf] }
  0x53   :  { %v1961_v48 = vor.u32 %v2191_v43, %v1960_v41  ;;  %v1826_v43 = vld [vmem:[#allocation4 + $0xe8] sm:$0xf0] }
  0x54   :  { %663 = vmatpush.bf16.msrb.mxu1 %v1677_v46 }
  0x55   :  { %629 = vmatpush.bf16.msrb.mxu2 %v1465_v49  ;;  %v1824_v49 = vld [vmem:[#allocation4 + $0xe0] sm:$0xf] }
  0x56   :  { %655 = vmatpush.bf16.msrb.mxu0 %v1469_v54  ;;  %641 = vmatpush.bf16.msrb.mxu3 %v1609_v12  ;;  %v1825_v53 = vor.u32 %v2157_v50, %v1824_v49  ;;  %v1816_v54 = vld [vmem:[#allocation4 + $0xd0] sm:$0xf]  ;;  %v1897_v12 = vor.u32 %v2175_v9, %v1896_v7  ;;  %v2142_v49 = vld [vmem:[#allocation4 + $0x74] sm:$0xf]  ;;  %v1770_v50 = vld [vmem:[#allocation4 + $0x78] sm:$0xf0] }
  0x57   :  { %v1817_v56 = vor.u32 %v2155_v55, %v1816_v54  ;;  %v2181_v54 = vld [vmem:[#allocation4 + $0x1a4] sm:$0xf0]  ;;  %v1856_v7 = vld [vmem:[#allocation4 + $0x120] sm:$0xf] }
  0x58   :  { %664 = vmatpush.bf16.msrb.mxu1 %v1661_v57  ;;  %v1808_v57 = vld [vmem:[#allocation4 + $0xc0] sm:$0xf] }
  0x59   :  { %v1809_v59 = vor.u32 %v2153_v58, %v1808_v57  ;;  %v1818_v57 = vld [vmem:[#allocation4 + $0xd8] sm:$0xf0] }
  0x5a   :  { %642 = vmatpush.bf16.msrb.mxu3 %v1593_v20  ;;  %v1729_v20 = vor.u32 %v2133_v18, %v1728_v17  ;;  %v1802_v17 = vld [vmem:[#allocation4 + $0xb8] sm:$0xf0]  ;;  %v2190_v18 = vld [vmem:[#allocation4 + $0x1f4] sm:$0xf] }
  0x5c   :  { %665 = vmatpush.bf16.msrb.mxu1 %v1645_v63  ;;  %v1792_v63 = vld [vmem:[#allocation4 + $0xa0] sm:$0xf] }
  0x5d   :  { %v1793_v2 = vor.u32 %v2149_v0, %v1792_v63  ;;  %v1762_v63 = vld [vmem:[#allocation4 + $0x68] sm:$0xf0] }
  0x60   :  { %666 = vmatpush.bf16.msrb.mxu1 %v1629_v6  ;;  %v2135_v6 = vld [vmem:[#allocation4 + $0x34] sm:$0xf0] }
  0x61   :  { %v1737_v8 = vor.u32 %v2135_v6, %v1736_v5  ;;  %v1810_v5 = vld [vmem:[#allocation4 + $0xc8] sm:$0xf0] }
  0x64   :  { %667 = vmatpush.bf16.msrb.mxu1 %v1613_v13 }
  0x68   :  { %668 = vmatpush.bf16.msrb.mxu1 %v1597_v22 }
  0xa0   :  { %v151_v16 = vpop.f32.mrf.mxu1 }
  0xa1   :  { %v152_v19 = vadd.f32 %v151_v16, %v109_v11  ;;  %v2147_v11 = vld [vmem:[#allocation4 + $0x94] sm:$0xf0]  ;;  %v1945_v16 = vor.u32 %v2187_v15, %v1944_v14  ;;  %v2177_v14 = vld [vmem:[#allocation4 + $0x184] sm:$0xf0] }
  0xa2   :  { %v1785_v13 = vor.u32 %v2147_v11, %v1784_v10  ;;  %v2138_v10 = vld [vmem:[#allocation4 + $0x54] sm:$0xf]  ;;  %v1754_v11 = vld [vmem:[#allocation4 + $0x58] sm:$0xf0] }
  0xa3   :  { %vm168_vm3 = vcmp.gt.f32.partialorder %v152_v19, 0.0  ;;  %v170_v21 = vmul.f32 0.01, %v152_v19 }
  0xa5   :  { %v172_v23 = vsel %vm168_vm3, %v152_v19, %v170_v21  ;;  %v1888_v19 = vld [vmem:[#allocation4 + $0x160] sm:$0xf]  ;;  %v2173_v21 = vld [vmem:[#allocation4 + $0x164] sm:$0xf0] }
  0xa6   :  { %v174_v24 = vpack.c.bf16 %v172_v23, %v172_v23  ;;  %v1889_v22 = vor.u32 %v2173_v21, %v1888_v19  ;;  %v1776_v23 = vld [vmem:[#allocation4 + $0x80] sm:$0xf]  ;;  %v1848_v21 = vld [vmem:[#allocation4 + $0x110] sm:$0xf] }
  0xa8   :  { %v153_v25 = vpop.f32.mrf.mxu1  ;;  %578 = vmatmul.bf16.vlgmr.msra.gmra.mxu2 %v174_v24  ;;  %604 = vmatmul.bf16.vlgmr.msra.gmra.mxu0 %v174_v24 }
  0xa9   :  { %1080 = vmatpush.bf16.msra.mxu2 %v1769_v28  ;;  %1106 = vmatpush.bf16.msra.mxu0 %v1897_v12  ;;  %v1936_v25 = vld [vmem:[#allocation4 + $0x1c0] sm:$0xf]  ;;  %v2158_v28 = vld [vmem:[#allocation4 + $0xf4] sm:$0xf]  ;;  %v1757_v12 = vor.u32 %v2138_v10, %v1754_v11  ;;  %v2128_v10 = vld [vmem:[#allocation4 + $0x4] sm:$0xf] }
  0xaa   :  { %v1937_v30 = vor.u32 %v2185_v27, %v1936_v25  ;;  %v2136_v25 = vld [vmem:[#allocation4 + $0x44] sm:$0xf]  ;;  %v1714_v11 = vld [vmem:[#allocation4 + $0x8] sm:$0xf0] }
  0xad   :  { %1081 = vmatpush.bf16.msra.mxu2 %v1761_v31  ;;  %1107 = vmatpush.bf16.msra.mxu0 %v1889_v22  ;;  %v1837_v31 = vor.u32 %v2158_v28, %v1834_v29  ;;  %v2163_v22 = vld [vmem:[#allocation4 + $0x114] sm:$0xf0]  ;;  %v2148_v28 = vld [vmem:[#allocation4 + $0xa4] sm:$0xf]  ;;  %v1794_v29 = vld [vmem:[#allocation4 + $0xa8] sm:$0xf0] }
  0xb0   :  { %v164_v35 = vpop.f32.mrf.mxu1 }
  0xb1   :  { %v165_v37 = vadd.f32 %v164_v35, %v110_v32  ;;  %1082 = vmatpush.bf16.msra.mxu2 %v1753_v36  ;;  %v1720_v32 = vld [vmem:[#allocation4 + $0x10] sm:$0xf]  ;;  %v2171_v36 = vld [vmem:[#allocation4 + $0x154] sm:$0xf0] }
  0xb2   :  { %v1721_v35 = vor.u32 %v2131_v33, %v1720_v32  ;;  %v1881_v40 = vor.u32 %v2171_v36, %v1880_v34  ;;  %v1954_v32 = vld [vmem:[#allocation4 + $0x1e8] sm:$0xf0]  ;;  %v1840_v33 = vld [vmem:[#allocation4 + $0x100] sm:$0xf]  ;;  %v2161_v34 = vld [vmem:[#allocation4 + $0x104] sm:$0xf0] }
  0xb3   :  { %vm169_vm4 = vcmp.gt.f32.partialorder %v165_v37, 0.0  ;;  %v171_v42 = vmul.f32 0.01, %v165_v37  ;;  %v1841_v36 = vor.u32 %v2161_v34, %v1840_v33 }
  0xb4   :  { %1108 = vmatpush.bf16.msra.mxu0 %v1881_v40  ;;  %v2174_v40 = vld [vmem:[#allocation4 + $0x174] sm:$0xf] }
  0xb5   :  { %v173_v46 = vsel %vm169_vm4, %v165_v37, %v171_v42  ;;  %1083 = vmatpush.bf16.msra.mxu2 %v1745_v51  ;;  %v1928_v37 = vld [vmem:[#allocation4 + $0x1b0] sm:$0xf]  ;;  %v2156_v42 = vld [vmem:[#allocation4 + $0xe4] sm:$0xf] }
  0xb6   :  { %v175_v38 = vpack.c.bf16 %v173_v46, %v173_v46  ;;  %v1929_v41 = vor.u32 %v2183_v39, %v1928_v37  ;;  %v1829_v44 = vor.u32 %v2156_v42, %v1826_v43  ;;  %v2129_v46 = vld [vmem:[#allocation4 + $0x4] sm:$0xf0]  ;;  %v2134_v37 = vld [vmem:[#allocation4 + $0x34] sm:$0xf]  ;;  %v1738_v39 = vld [vmem:[#allocation4 + $0x38] sm:$0xf0] }
  0xb7   :  { %v1898_v42 = vld [vmem:[#allocation4 + $0x178] sm:$0xf0] }
  0xb8   :  { %v166_v52 = vpop.f32.mrf.mxu1  ;;  %591 = vmatmul.bf16.vlgmr.msra.gmra.mxu3 %v175_v38  ;;  %617 = vmatmul.bf16.vlgmr.msra.gmra.mxu1 %v175_v38  ;;  %v1901_v43 = vor.u32 %v2174_v40, %v1898_v42 }
  0xb9   :  { %630 = vmatmul.bf16.vlgmr.msrb.gmra.mxu2 %v174_v24  ;;  %656 = vmatmul.bf16.vlgmr.msrb.gmra.mxu0 %v174_v24  ;;  %v2145_v24 = vld [vmem:[#allocation4 + $0x84] sm:$0xf0]  ;;  %v1773_v52 = vor.u32 %v2142_v49, %v1770_v50  ;;  %v2132_v50 = vld [vmem:[#allocation4 + $0x24] sm:$0xf] }
  0xba   :  { %1093 = vmatpush.bf16.msra.mxu3 %v1833_v47  ;;  %1119 = vmatpush.bf16.msra.mxu1 %v1961_v48  ;;  %v1777_v26 = vor.u32 %v2145_v24, %v1776_v23  ;;  %v1713_v47 = vor.u32 %v2129_v46, %v1712_v45  ;;  %v2169_v48 = vld [vmem:[#allocation4 + $0x144] sm:$0xf0]  ;;  %v1849_v24 = vor.u32 %v2163_v22, %v1848_v21  ;;  %v1786_v45 = vld [vmem:[#allocation4 + $0x98] sm:$0xf0]  ;;  %v2186_v46 = vld [vmem:[#allocation4 + $0x1d4] sm:$0xf] }
  0xbb   :  { %1084 = vmatpush.bf16.msra.mxu2 %v1737_v8  ;;  %v2165_v8 = vld [vmem:[#allocation4 + $0x124] sm:$0xf0]  ;;  %v1866_v21 = vld [vmem:[#allocation4 + $0x138] sm:$0xf0] }
  0xbc   :  { %v1857_v9 = vor.u32 %v2165_v8, %v1856_v7  ;;  %v2444_v7 = vld [vmem:[%s2466_s4] sm:$0xf] }
  0xbd   :  { %v242_v33 = vperm.slane %v2444_v7, 0 }
  0xbe   :  { %1094 = vmatpush.bf16.msra.mxu3 %v1825_v53  ;;  %1120 = vmatpush.bf16.msra.mxu1 %v1953_v4  ;;  %v1920_v53 = vld [vmem:[#allocation4 + $0x1a0] sm:$0xf]  ;;  %v2152_v4 = vld [vmem:[#allocation4 + $0xc4] sm:$0xf] }
  0xbf   :  { %1085 = vmatpush.bf16.msra.mxu2 %v1729_v20  ;;  %v1921_v55 = vor.u32 %v2181_v54, %v1920_v53  ;;  %v1813_v6 = vor.u32 %v2152_v4, %v1810_v5  ;;  %v1962_v20 = vld [vmem:[#allocation4 + $0x1f8] sm:$0xf0]  ;;  %v1890_v54 = vld [vmem:[#allocation4 + $0x168] sm:$0xf0]  ;;  %v2182_v5 = vld [vmem:[#allocation4 + $0x1b4] sm:$0xf] }
  0xc0   :  { %v1965_v23 = vor.u32 %v2190_v18, %v1962_v20  ;;  %v1922_v18 = vld [vmem:[#allocation4 + $0x1a8] sm:$0xf0]  ;;  %v2166_v20 = vld [vmem:[#allocation4 + $0x134] sm:$0xf] }
  0xc2   :  { %1095 = vmatpush.bf16.msra.mxu3 %v1817_v56  ;;  %1121 = vmatpush.bf16.msra.mxu1 %v1945_v16  ;;  %v2154_v56 = vld [vmem:[#allocation4 + $0xd4] sm:$0xf] }
  0xc3   :  { %1086 = vmatpush.bf16.msra.mxu2 %v1721_v35  ;;  %v1821_v58 = vor.u32 %v2154_v56, %v1818_v57  ;;  %v2150_v16 = vld [vmem:[#allocation4 + $0xb4] sm:$0xf]  ;;  %v2144_v56 = vld [vmem:[#allocation4 + $0x84] sm:$0xf]  ;;  %v1778_v57 = vld [vmem:[#allocation4 + $0x88] sm:$0xf0] }
  0xc4   :  { %v1805_v19 = vor.u32 %v2150_v16, %v1802_v17  ;;  %v2180_v17 = vld [vmem:[#allocation4 + $0x1a4] sm:$0xf] }
  0xc6   :  { %1096 = vmatpush.bf16.msra.mxu3 %v1809_v59  ;;  %1122 = vmatpush.bf16.msra.mxu1 %v1937_v30  ;;  %v1864_v59 = vld [vmem:[#allocation4 + $0x130] sm:$0xf]  ;;  %v2188_v30 = vld [vmem:[#allocation4 + $0x1e4] sm:$0xf] }
  0xc7   :  { %1087 = vmatpush.bf16.msra.mxu2 %v1713_v47  ;;  %v1865_v61 = vor.u32 %v2167_v60, %v1864_v59  ;;  %v1957_v35 = vor.u32 %v2188_v30, %v1954_v32  ;;  %v1781_v59 = vor.u32 %v2144_v56, %v1778_v57  ;;  %v1938_v60 = vld [vmem:[#allocation4 + $0x1c8] sm:$0xf0] }
  0xc8   :  { %643 = vmatmul.bf16.vlgmr.msrb.gmra.mxu3 %v175_v38  ;;  %669 = vmatmul.bf16.vlgmr.msrb.gmra.mxu1 %v175_v38  ;;  %v1872_v38 = vld [vmem:[#allocation4 + $0x140] sm:$0xf]  ;;  %v1906_v32 = vld [vmem:[#allocation4 + $0x188] sm:$0xf0] }
  0xc9   :  { %v1873_v51 = vor.u32 %v2169_v48, %v1872_v38  ;;  %v1946_v48 = vld [vmem:[#allocation4 + $0x1d8] sm:$0xf0] }
  0xca   :  { %1097 = vmatpush.bf16.msra.mxu3 %v1801_v62  ;;  %1123 = vmatpush.bf16.msra.mxu1 %v1929_v41  ;;  %v2140_v62 = vld [vmem:[#allocation4 + $0x64] sm:$0xf]  ;;  %v1741_v41 = vor.u32 %v2134_v37, %v1738_v39  ;;  %v1949_v49 = vor.u32 %v2186_v46, %v1946_v48  ;;  %v2162_v37 = vld [vmem:[#allocation4 + $0x114] sm:$0xf]  ;;  %v1850_v39 = vld [vmem:[#allocation4 + $0x118] sm:$0xf0] }
  0xcb   :  { %1109 = vmatpush.bf16.msra.mxu0 %v1873_v51  ;;  %1132 = vmatpush.bf16.msrb.mxu2 %v1773_v52  ;;  %v1765_v0 = vor.u32 %v2140_v62, %v1762_v63  ;;  %v1730_v51 = vld [vmem:[#allocation4 + $0x28] sm:$0xf0]  ;;  %v2172_v52 = vld [vmem:[#allocation4 + $0x164] sm:$0xf]  ;;  %v2130_v62 = vld [vmem:[#allocation4 + $0x14] sm:$0xf] }
  0xcc   :  { %v1733_v53 = vor.u32 %v2132_v50, %v1730_v51  ;;  %v1722_v63 = vld [vmem:[#allocation4 + $0x18] sm:$0xf0]  ;;  %v1842_v50 = vld [vmem:[#allocation4 + $0x108] sm:$0xf0] }
  0xce   :  { %1098 = vmatpush.bf16.msra.mxu3 %v1793_v2  ;;  %1124 = vmatpush.bf16.msra.mxu1 %v1921_v55  ;;  %v2179_v2 = vld [vmem:[#allocation4 + $0x194] sm:$0xf0]  ;;  %v1893_v55 = vor.u32 %v2172_v52, %v1890_v54  ;;  %v245_v54 = vperm.slane %v2444_v7, 3 }
  0xcf   :  { %v1913_v3 = vor.u32 %v2179_v2, %v1912_v1  ;;  %1110 = vmatpush.bf16.msra.mxu0 %v1865_v61  ;;  %1133 = vmatpush.bf16.msrb.mxu2 %v1765_v0  ;;  %v2170_v0 = vld [vmem:[#allocation4 + $0x154] sm:$0xf]  ;;  %v1725_v2 = vor.u32 %v2130_v62, %v1722_v63  ;;  %v244_v63 = vperm.slane %v2444_v7, 2 }
  0xd0   :  { %v2198_v62 = vld [vmem:[#allocation6 + $0x30] sm:$0xff] }
  0xd2   :  { %1099 = vmatpush.bf16.msra.mxu3 %v1785_v13  ;;  %1125 = vmatpush.bf16.msra.mxu1 %v1913_v3  ;;  %v1904_v13 = vld [vmem:[#allocation4 + $0x180] sm:$0xf]  ;;  %v1882_v3 = vld [vmem:[#allocation4 + $0x158] sm:$0xf0] }
  0xd3   :  { %v1905_v15 = vor.u32 %v2177_v14, %v1904_v13  ;;  %1111 = vmatpush.bf16.msra.mxu0 %v1857_v9  ;;  %1134 = vmatpush.bf16.msrb.mxu2 %v1757_v12  ;;  %v1885_v4 = vor.u32 %v2170_v0, %v1882_v3  ;;  %v2168_v12 = vld [vmem:[#allocation4 + $0x144] sm:$0xf]  ;;  %v1717_v13 = vor.u32 %v2128_v10, %v1714_v11  ;;  %v1874_v14 = vld [vmem:[#allocation4 + $0x148] sm:$0xf0] }
  0xd4   :  { %v1877_v16 = vor.u32 %v2168_v12, %v1874_v14  ;;  %v2195_v14 = vld [vmem:[#allocation6 + $0x18] sm:$0xff] }
  0xd6   :  { %1100 = vmatpush.bf16.msra.mxu3 %v1777_v26  ;;  %v1746_v26 = vld [vmem:[#allocation4 + $0x48] sm:$0xf0]  ;;  %1126 = vmatpush.bf16.msra.mxu1 %v1905_v15  ;;  %v243_v15 = vperm.slane %v2444_v7, 1 }
  0xd7   :  { %v1749_v27 = vor.u32 %v2136_v25, %v1746_v26  ;;  %1112 = vmatpush.bf16.msra.mxu0 %v1849_v24  ;;  %v2178_v24 = vld [vmem:[#allocation4 + $0x194] sm:$0xf]  ;;  %v1914_v25 = vld [vmem:[#allocation4 + $0x198] sm:$0xf0]  ;;  %v2164_v26 = vld [vmem:[#allocation4 + $0x124] sm:$0xf] }
  0xd8   :  { %v2197_v7 = vld [vmem:[#allocation6 + $0x28] sm:$0xff] }
  0xd9   :  { %1135 = vmatpush.bf16.msrb.mxu2 %v1749_v27 }
  0xda   :  { %1145 = vmatpush.bf16.msrb.mxu3 %v1837_v31  ;;  %1171 = vmatpush.bf16.msrb.mxu1 %v1965_v23  ;;  %v1797_v31 = vor.u32 %v2148_v28, %v1794_v29  ;;  %v1869_v23 = vor.u32 %v2166_v20, %v1866_v21  ;;  %v1917_v28 = vor.u32 %v2178_v24, %v1914_v25  ;;  %v1858_v29 = vld [vmem:[#allocation4 + $0x128] sm:$0xf0]  ;;  %v2192_v20 = vld [vmem:[#allocation6] sm:$0xff] }
  0xdb   :  { %1113 = vmatpush.bf16.msra.mxu0 %v1841_v36  ;;  %v1861_v36 = vor.u32 %v2164_v26, %v1858_v29  ;;  %v2204_v21 = vld [vmem:[#allocation6 + $0x60] sm:$0xff]  ;;  %v2201_v25 = vld [vmem:[#allocation6 + $0x48] sm:$0xff] }
  0xdc   :  { %v754_v26 = vld [vmem:[%s2468_s6] sm:$0x3] }
  0xdd   :  { %1136 = vmatpush.bf16.msrb.mxu2 %v1741_v41  ;;  %v756_v29 = vperm.slane %v754_v26, 0 }
  0xde   :  { %1146 = vmatpush.bf16.msrb.mxu3 %v1829_v44  ;;  %1172 = vmatpush.bf16.msrb.mxu1 %v1957_v35  ;;  %v2146_v44 = vld [vmem:[#allocation4 + $0x94] sm:$0xf] }
  0xdf   :  { %v1789_v47 = vor.u32 %v2146_v44, %v1786_v45  ;;  %1158 = vmatpush.bf16.msrb.mxu0 %v1901_v43  ;;  %v1853_v44 = vor.u32 %v2162_v37, %v1850_v39 }
  0xe1   :  { %1137 = vmatpush.bf16.msrb.mxu2 %v1733_v53 }
  0xe2   :  { %1147 = vmatpush.bf16.msrb.mxu3 %v1821_v58  ;;  %1173 = vmatpush.bf16.msrb.mxu1 %v1949_v49  ;;  %v2184_v58 = vld [vmem:[#allocation4 + $0x1c4] sm:$0xf] }
  0xe3   :  { %1159 = vmatpush.bf16.msrb.mxu0 %v1893_v55  ;;  %v1941_v61 = vor.u32 %v2184_v58, %v1938_v60  ;;  %v2160_v49 = vld [vmem:[#allocation4 + $0x104] sm:$0xf]  ;;  %v2199_v58 = vld [vmem:[#allocation6 + $0x38] sm:$0xff] }
  0xe4   :  { %v1845_v53 = vor.u32 %v2160_v49, %v1842_v50 }
  0xe5   :  { %1138 = vmatpush.bf16.msrb.mxu2 %v1725_v2 }
  0xe6   :  { %1148 = vmatpush.bf16.msrb.mxu3 %v1813_v6  ;;  %1174 = vmatpush.bf16.msrb.mxu1 %v1941_v61  ;;  %v1930_v6 = vld [vmem:[#allocation4 + $0x1b8] sm:$0xf0] }
  0xe7   :  { %v1933_v9 = vor.u32 %v2182_v5, %v1930_v6  ;;  %1160 = vmatpush.bf16.msrb.mxu0 %v1885_v4 }
  0xe9   :  { %1139 = vmatpush.bf16.msrb.mxu2 %v1717_v13  ;;  %v2196_v13 = vld [vmem:[#allocation6 + $0x20] sm:$0xff] }
  0xea   :  { %1149 = vmatpush.bf16.msrb.mxu3 %v1805_v19  ;;  %1175 = vmatpush.bf16.msrb.mxu1 %v1933_v9  ;;  %v1925_v19 = vor.u32 %v2180_v17, %v1922_v18  ;;  %v2206_v17 = vld [vmem:[#allocation6 + $0x70] sm:$0xff]  ;;  %v2193_v18 = vld [vmem:[#allocation6 + $0x8] sm:$0xff] }
  0xeb   :  { %1161 = vmatpush.bf16.msrb.mxu0 %v1877_v16  ;;  %v2194_v16 = vld [vmem:[#allocation6 + $0x10] sm:$0xff] }
  0xee   :  { %1150 = vmatpush.bf16.msrb.mxu3 %v1797_v31  ;;  %1176 = vmatpush.bf16.msrb.mxu1 %v1925_v19  ;;  %v2176_v31 = vld [vmem:[#allocation4 + $0x184] sm:$0xf]  ;;  %v2205_v19 = vld [vmem:[#allocation6 + $0x68] sm:$0xff] }
  0xef   :  { %1162 = vmatpush.bf16.msrb.mxu0 %v1869_v23  ;;  %v1909_v41 = vor.u32 %v2176_v31, %v1906_v32  ;;  %v2202_v23 = vld [vmem:[#allocation6 + $0x50] sm:$0xff]  ;;  %v2215_v32 = vld [vmem:[#allocation7 + $0x38] sm:$0xff] }
  0xf2   :  { %1151 = vmatpush.bf16.msrb.mxu3 %v1789_v47  ;;  %1177 = vmatpush.bf16.msrb.mxu1 %v1917_v28  ;;  %v2200_v28 = vld [vmem:[#allocation6 + $0x40] sm:$0xff] }
  0xf3   :  { %1163 = vmatpush.bf16.msrb.mxu0 %v1861_v36 }
  0xf6   :  { %1152 = vmatpush.bf16.msrb.mxu3 %v1781_v59  ;;  %1178 = vmatpush.bf16.msrb.mxu1 %v1909_v41 }
  0xf7   :  { %1164 = vmatpush.bf16.msrb.mxu0 %v1853_v44 }
  0xfb   :  { %1165 = vmatpush.bf16.msrb.mxu0 %v1845_v53 }
 0x125   :  { %v605_v38 = vpop.f32.mrf.mxu0 }
 0x126   :  { %v606_v27 = vadd.f32 %v605_v38, %v243_v15  ;;  %v2207_v15 = vld [vmem:[#allocation6 + $0x78] sm:$0xff] }
 0x12b   :  { %v579_v1 = vpop.f32.mrf.mxu2 }
 0x12c   :  { %v580_v42 = vadd.f32 %v579_v1, %v242_v33 }
 0x12d   :  { %v607_v8 = vpop.f32.mrf.mxu0 }
 0x133   :  { %v581_v22 = vpop.f32.mrf.mxu2 }
 0x134   :  { %v2203_v22 = vld [vmem:[#allocation6 + $0x58] sm:$0xff] }
 0x135   :  { %v618_v30 = vpop.f32.mrf.mxu1 }
 0x136   :  { %v619_v34 = vadd.f32 %v618_v30, %v606_v27  ;;  %v657_v35 = vpop.f32.mrf.mxu0 }
 0x137   :  { %v658_v59 = vadd.f32 %v657_v35, %v245_v54 }
 0x138   :  { %vm675_vm5 = vcmp.gt.f32.partialorder %v619_v34, 0.0  ;;  %v679_v40 = vmul.f32 0.01, %v619_v34 }
 0x13a   :  { %v683_v43 = vsel %vm675_vm5, %v619_v34, %v679_v40  ;;  %v2214_v34 = vld [vmem:[#allocation7 + $0x30] sm:$0xff] }
 0x13b   :  { %v687_v45 = vpack.c.bf16 %v683_v43, %v683_v43  ;;  %v592_v46 = vpop.f32.mrf.mxu3 }
 0x13c   :  { %v593_v38 = vadd.f32 %v592_v46, %v580_v42  ;;  %v631_v47 = vpop.f32.mrf.mxu2  ;;  %v757_v46 = vperm.slane %v754_v26, 1 }
 0x13d   :  { %v620_v48 = vpop.f32.mrf.mxu1  ;;  %1101 = vmatmul.bf16.vlgmr.msra.gmra.mxu3 %v687_v45  ;;  %v632_v2 = vadd.f32 %v631_v47, %v244_v63  ;;  %v2211_v63 = vld [vmem:[#allocation7 + $0x18] sm:$0xff] }
 0x13e   :  { %vm674_vm6 = vcmp.gt.f32.partialorder %v593_v38, 0.0  ;;  %v678_v51 = vmul.f32 0.01, %v593_v38  ;;  %v659_v52 = vpop.f32.mrf.mxu0  ;;  %1337 = vmatpush.bf16.msra.mxu3 %v2207_v15 }
 0x140   :  { %v682_v55 = vsel %vm674_vm6, %v593_v38, %v678_v51 }
 0x141   :  { %v686_v56 = vpack.c.bf16 %v682_v55, %v682_v55 }
 0x142   :  { %1338 = vmatpush.bf16.msra.mxu3 %v2206_v17 }
 0x143   :  { %v594_v57 = vpop.f32.mrf.mxu3  ;;  %1088 = vmatmul.bf16.vlgmr.msra.gmra.mxu2 %v686_v56 }
 0x144   :  { %v633_v60 = vpop.f32.mrf.mxu2  ;;  %1324 = vmatpush.bf16.msra.mxu2 %v2199_v58 }
 0x145   :  { %v670_v61 = vpop.f32.mrf.mxu1 }
 0x146   :  { %v671_v0 = vadd.f32 %v670_v61, %v658_v59  ;;  %1339 = vmatpush.bf16.msra.mxu3 %v2205_v19  ;;  %v2213_v61 = vld [vmem:[#allocation7 + $0x28] sm:$0xff] }
 0x148   :  { %vm677_vm7 = vcmp.gt.f32.partialorder %v671_v0, 0.0  ;;  %v681_v1 = vmul.f32 0.01, %v671_v0  ;;  %1325 = vmatpush.bf16.msra.mxu2 %v2198_v62  ;;  %v2212_v62 = vld [vmem:[#allocation7 + $0x20] sm:$0xff] }
 0x14a   :  { %v685_v3 = vsel %vm677_vm7, %v671_v0, %v681_v1  ;;  %1340 = vmatpush.bf16.msra.mxu3 %v2204_v21  ;;  %v2210_v0 = vld [vmem:[#allocation7 + $0x10] sm:$0xff]  ;;  %v2209_v1 = vld [vmem:[#allocation7 + $0x8] sm:$0xff] }
 0x14b   :  { %v689_v4 = vpack.c.bf16 %v685_v3, %v685_v3  ;;  %v644_v5 = vpop.f32.mrf.mxu3 }
 0x14c   :  { %v645_v6 = vadd.f32 %v644_v5, %v632_v2  ;;  %1326 = vmatpush.bf16.msra.mxu2 %v2197_v7  ;;  %v2208_v2 = vld [vmem:[#allocation7] sm:$0xff] }
 0x14d   :  { %v672_v8 = vpop.f32.mrf.mxu1  ;;  %1127 = vmatmul.bf16.vlgmr.msra.gmra.mxu1 %v689_v4  ;;  %1153 = vmatmul.bf16.vlgmr.msrb.gmra.mxu3 %v687_v45  ;;  %v2227_v5 = vld [vmem:[%s2470_s8] ss:$0 sm:$0xff] }
 0x14e   :  { %vm676_vm8 = vcmp.gt.f32.partialorder %v645_v6, 0.0  ;;  %v680_v9 = vmul.f32 0.01, %v645_v6  ;;  %1341 = vmatpush.bf16.msra.mxu3 %v2203_v22 }
 0x150   :  { %v684_v10 = vsel %vm676_vm8, %v645_v6, %v680_v9  ;;  %1327 = vmatpush.bf16.msra.mxu2 %v2196_v13  ;;  %v2228_v13 = vld [vmem:[%s2472_s10] ss:$0 sm:$0xff] }
 0x151   :  { %v688_v11 = vpack.c.bf16 %v684_v10, %v684_v10 }
 0x152   :  { %1342 = vmatpush.bf16.msra.mxu3 %v2202_v23 }
 0x153   :  { %v646_v12 = vpop.f32.mrf.mxu3  ;;  %1114 = vmatmul.bf16.vlgmr.msra.gmra.mxu0 %v688_v11  ;;  %1140 = vmatmul.bf16.vlgmr.msrb.gmra.mxu2 %v686_v56 }
 0x154   :  { %1328 = vmatpush.bf16.msra.mxu2 %v2195_v14  ;;  %1422 = vmatpush.bf16.msra.mxu0 %v2215_v32 }
 0x156   :  { %1343 = vmatpush.bf16.msra.mxu3 %v2201_v25 }
 0x158   :  { %1329 = vmatpush.bf16.msra.mxu2 %v2194_v16  ;;  %1423 = vmatpush.bf16.msra.mxu0 %v2214_v34 }
 0x15a   :  { %1344 = vmatpush.bf16.msra.mxu3 %v2200_v28 }
 0x15c   :  { %1330 = vmatpush.bf16.msra.mxu2 %v2193_v18  ;;  %1424 = vmatpush.bf16.msra.mxu0 %v2213_v61 }
 0x15d   :  { %1179 = vmatmul.bf16.vlgmr.msrb.gmra.mxu1 %v689_v4 }
 0x160   :  { %1331 = vmatpush.bf16.msra.mxu2 %v2192_v20  ;;  %1425 = vmatpush.bf16.msra.mxu0 %v2212_v62 }
 0x163   :  { %1166 = vmatmul.bf16.vlgmr.msrb.gmra.mxu0 %v688_v11 }
 0x164   :  { %1426 = vmatpush.bf16.msra.mxu0 %v2211_v63 }
 0x168   :  { %1427 = vmatpush.bf16.msra.mxu0 %v2210_v0 }
 0x16c   :  { %1428 = vmatpush.bf16.msra.mxu0 %v2209_v1 }
 0x170   :  { %1429 = vmatpush.bf16.msra.mxu0 %v2208_v2 }
 0x1c0   :  { %v1102_v24 = vpop.f32.mrf.mxu3 }
 0x1c6   :  { %v1089_v27 = vpop.f32.mrf.mxu2 }
 0x1c7   :  { %v1090_v33 = vadd.f32 %v1089_v27, %v756_v29 }
 0x1c8   :  { %v1104_v30 = vpop.f32.mrf.mxu3 }
 0x1c9   :  { %v1103_v36 = vadd.f32 %v1102_v24, %v1090_v33 }
 0x1ca   :  { %v1128_v31 = vpop.f32.mrf.mxu1 }
 0x1ce   :  { %v1091_v35 = vpop.f32.mrf.mxu2 }
 0x1d0   :  { %v1115_v37 = vpop.f32.mrf.mxu0  ;;  %v1154_v39 = vpop.f32.mrf.mxu3 }
 0x1d1   :  { %v1116_v40 = vadd.f32 %v1115_v37, %v1103_v36 }
 0x1d2   :  { %v1130_v41 = vpop.f32.mrf.mxu1 }
 0x1d3   :  { %v1129_v42 = vadd.f32 %v1128_v31, %v1116_v40 }
 0x1d5   :  { %vm1184_vm9 = vcmp.gt.f32.partialorder %v1129_v42, 0.0  ;;  %v1186_v43 = vmul.f32 0.01, %v1129_v42 }
 0x1d6   :  { %v1141_v44 = vpop.f32.mrf.mxu2 }
 0x1d7   :  { %v1188_v45 = vsel %vm1184_vm9, %v1129_v42, %v1186_v43  ;;  %v1142_v50 = vadd.f32 %v1141_v44, %v757_v46 }
 0x1d8   :  { %v1190_v38 = vpack.c.bf16 %v1188_v45, %v1188_v45  ;;  %v1117_v47 = vpop.f32.mrf.mxu0  ;;  %v1156_v48 = vpop.f32.mrf.mxu3 }
 0x1d9   :  { %v1155_v52 = vadd.f32 %v1154_v39, %v1142_v50 }
 0x1da   :  { %v1180_v49 = vpop.f32.mrf.mxu1  ;;  %1332 = vmatmul.bf16.vlgmr.msra.gmra.mxu2 %v1190_v38 }
 0x1de   :  { %v1143_v51 = vpop.f32.mrf.mxu2 }
 0x1e0   :  { %v1167_v53 = vpop.f32.mrf.mxu0 }
 0x1e1   :  { %v1168_v54 = vadd.f32 %v1167_v53, %v1155_v52 }
 0x1e2   :  { %v1182_v55 = vpop.f32.mrf.mxu1 }
 0x1e3   :  { %v1181_v56 = vadd.f32 %v1180_v49, %v1168_v54 }
 0x1e5   :  { %vm1185_vm10 = vcmp.gt.f32.partialorder %v1181_v56, 0.0  ;;  %v1187_v57 = vmul.f32 0.01, %v1181_v56 }
 0x1e7   :  { %v1189_v58 = vsel %vm1185_vm10, %v1181_v56, %v1187_v57 }
 0x1e8   :  { %v1191_v59 = vpack.c.bf16 %v1189_v58, %v1189_v58  ;;  %v1169_v60 = vpop.f32.mrf.mxu0 }
 0x1ea   :  { %1345 = vmatmul.bf16.vlgmr.msra.gmra.mxu3 %v1191_v59 }
 0x25d   :  { %v1333_v3 = vpop.f32.mrf.mxu2 }
 0x25e   :  { %v1334_v6 = vadd.f32 %v2227_v5, %v1333_v3 }
 0x265   :  { %v1335_v4 = vpop.f32.mrf.mxu2 }
 0x26d   :  { %v1346_v8 = vpop.f32.mrf.mxu3 }
 0x26e   :  { %v1347_v9 = vadd.f32 %v1346_v8, %v1334_v6 }
 0x270   :  { %vm1350_vm11 = vcmp.gt.f32.partialorder %v1347_v9, 0.0  ;;  %v1351_v10 = vmul.f32 0.01, %v1347_v9 }
 0x272   :  { %v1352_v11 = vsel %vm1350_vm11, %v1347_v9, %v1351_v10 }
 0x273   :  { %v1353_v12 = vpack.c.bf16 %v1352_v11, %v1352_v11 }
 0x275   :  { %v1348_v7 = vpop.f32.mrf.mxu3  ;;  %1430 = vmatmul.bf16.vlgmr.msra.gmra.mxu0 %v1353_v12 }
 0x2f2   :  { %v1431_v14 = vpop.f32.mrf.mxu0 }
 0x2f3   :  { %v1432_v15 = vadd.f32 %v2228_v13, %v1431_v14 }
 0x2f5   :  { %v1435_v16 = vpack.c.bf16 %v1432_v15, %v1432_v15 }
 0x2f7   :  { %1436 = vst [vmem:[%s2473_s11] sm:$0xf] %v1435_v16 }
 0x2fa   :  { %v1433_v17 = vpop.f32.mrf.mxu0 }
 0x2fb   :  { %1441 = vsyncpa [#allocation3], 1 }
 0x2fc   :  { %1442 = vsyncpa [#allocation5], 1 }
 0x2fd   :  { %1443 = vsyncpa [#allocation8], 1 }

</bundles_post_ra>
